<compile_context>
chip_gen: v7x
topology: tpu7x:2x2x1
jax: 0.10.0
libtpu: 0.0.40
codegen_flags: <defaults>
</compile_context>

<pallas_src>
import functools

import jax
import jax.numpy as jnp
from jax.experimental import pallas as pl
from jax.experimental.pallas import tpu as pltpu


def _patch_embed_kernel(xT_ref, w_ref, p_ref, o_ref, *, inv_d):
    # xT_ref: (1, K, tn)  transposed patch tile for one image (K = C_in*p*p)
    # w_ref : (D, K)      conv weight as a dense matrix, channel-major
    # p_ref : (D, 3)      packed [conv bias | LN gamma | LN beta]
    # o_ref : (1, D, tn)  channel-major output tile (already in BCHW order)
    x = xT_ref[0]                                                     # (K, tn)
    y = jnp.dot(w_ref[...], x, preferred_element_type=jnp.float32)    # (D, tn)  MXU, f32 acc

    bias = p_ref[:, 0:1].astype(jnp.float32)                          # (D, 1)
    gamma = p_ref[:, 1:2].astype(jnp.float32)
    beta = p_ref[:, 2:3].astype(jnp.float32)
    y = y + bias

    # LayerNorm over channels (sublane axis), two-pass variance in f32 (matches PyTorch LN).
    mean = jnp.sum(y, axis=0, keepdims=True) * inv_d                  # (1, tn)
    yc = y - mean
    var = jnp.sum(yc * yc, axis=0, keepdims=True) * inv_d             # (1, tn)
    ynorm = yc * jax.lax.rsqrt(var + 1e-5)                            # rsqrt on the EUP

    o_ref[0] = (ynorm * gamma + beta).astype(o_ref.dtype)


def _pick_patch_tile(L, target=1024):
    """Largest multiple-of-128 divisor of L that is <= target, else the whole image.

    Either choice needs no row padding, so no output slice/copy afterwards.
    """
    tn = L
    cand = 128
    while cand <= min(L, target):
        if L % cand == 0:
            tn = cand
        cand += 128
    return tn


def patch_embedding(x, conv_w, conv_b, ln_gamma, ln_beta, patch_size,
                    *, compute_dtype=jnp.bfloat16):
    """x: [B, C_in, H, W] (NCHW).  conv_w: [C_out, C_in, p, p].  Returns [B, C_out, H/p, W/p].

    compute_dtype: dtype of the matmul operands (bf16 recommended; LN math stays f32 and the
    output keeps x.dtype).
    """
    B, C, H, W = x.shape
    D = conv_w.shape[0]
    p = patch_size
    assert H % p == 0 and W % p == 0, "spatial dims must be divisible by patch_size"
    Hp, Wp = H // p, W // p
    K = C * p * p
    L = Hp * Wp
    out_dtype = x.dtype

    # --- glue: transposed patchify -> [B, K, L] (cast first so this pass moves half bytes).
    # K ordered as (c, kh, kw) to match conv_w.reshape(D, K); L in (hp, wp) raster order so
    # the kernel's channel-major output is already BCHW-contiguous.
    xc = x.astype(compute_dtype)
    xt = xc.reshape(B, C, Hp, p, Wp, p)
    xt = xt.transpose(0, 1, 3, 5, 2, 4)            # [B, C, kh, kw, Hp, Wp]
    xt = xt.reshape(B, K, L)

    w_mat = conv_w.reshape(D, K).astype(compute_dtype)                 # (D, K)
    params = jnp.stack(
        [conv_b.astype(jnp.float32),
         ln_gamma.astype(jnp.float32),
         ln_beta.astype(jnp.float32)], axis=-1)                        # (D, 3)

    # --- tiling over the patch axis: divisor tiles => zero padded rows, lane-dense stores.
    tn = _pick_patch_tile(L)
    T = L // tn
    # Note: for B == 1 and T == 1 the grid collapses to one step (v7x megacore idles);
    # typical Swin batches have B >= 2 so both "parallel" axes keep both TCs busy.

    kernel = functools.partial(_patch_embed_kernel, inv_d=1.0 / D)

    out = pl.pallas_call(
        kernel,
        out_shape=jax.ShapeDtypeStruct((B, D, L), out_dtype),
        grid=(B, T),
        in_specs=[
            pl.BlockSpec((1, K, tn), lambda b, i: (b, 0, i)),
            pl.BlockSpec((D, K), lambda b, i: (0, 0)),
            pl.BlockSpec((D, 3), lambda b, i: (0, 0)),
        ],
        out_specs=pl.BlockSpec((1, D, tn), lambda b, i: (b, 0, i)),
        compiler_params=pltpu.CompilerParams(
            dimension_semantics=("parallel", "parallel")),
    )(xt, w_mat, params)

    # Free reshape only -- no slice, no transpose.
    return out.reshape(B, D, Hp, Wp)


def _reference(x, conv_w, conv_b, ln_gamma, ln_beta, patch):
    y = jax.lax.conv_general_dilated(
        x, conv_w, window_strides=(patch, patch), padding="VALID",
        dimension_numbers=("NCHW", "OIHW", "NCHW"))
    y = y + conv_b[None, :, None, None]
    y = jnp.transpose(y, (0, 2, 3, 1))                      # BHWC
    mean = y.mean(-1, keepdims=True)
    var = ((y - mean) ** 2).mean(-1, keepdims=True)
    y = (y - mean) / jnp.sqrt(var + 1e-5) * ln_gamma + ln_beta
    return jnp.transpose(y, (0, 3, 1, 2))                   # BCHW


if __name__ == "__main__":
    key = jax.random.PRNGKey(0)
    k_x, k_w, k_b, k_g, k_be = jax.random.split(key, 5)

    # Small shapes consistent with the module defaults (in_channels=3, out_channels=96, patch=4).
    B, C_in, H, W = 2, 3, 16, 16
    C_out = 96
    patch = 4

    x = jax.random.normal(k_x, (B, C_in, H, W), dtype=jnp.float32)
    conv_w = jax.random.normal(k_w, (C_out, C_in, patch, patch), dtype=jnp.float32) * 0.05
    conv_b = jax.random.normal(k_b, (C_out,), dtype=jnp.float32) * 0.05
    ln_gamma = jnp.ones((C_out,), dtype=jnp.float32) + 0.01 * jax.random.normal(k_g, (C_out,))
    ln_beta = 0.01 * jax.random.normal(k_be, (C_out,), dtype=jnp.float32)

    y = patch_embedding(x, conv_w, conv_b, ln_gamma, ln_beta, patch)
    jax.block_until_ready(y)

    assert y.shape == (B, C_out, H // patch, W // patch), y.shape

    # Reference is full f32; kernel matmul operands are bf16 (LN in f32) -> loose tolerance.
    y_ref = _reference(x, conv_w, conv_b, ln_gamma, ln_beta, patch)
    max_err = float(jnp.abs(y.astype(jnp.float32) - y_ref).max())
    assert jnp.allclose(y.astype(jnp.float32), y_ref, atol=5e-2, rtol=5e-2), max_err

    print("KERNEL_OK")
</pallas_src>

<mosaic_0001>
module attributes {stable_mosaic.version = 11 : i64} {
  func.func @_patch_embed_kernel(%arg0: i32, %arg1: i32, %arg2: memref<1x48x16xbf16, #tpu.memory_space<vmem>>, %arg3: memref<96x48xbf16, #tpu.memory_space<vmem>>, %arg4: memref<96x3xf32, #tpu.memory_space<vmem>>, %arg5: memref<1x96x16xf32, #tpu.memory_space<vmem>>) attributes {dimension_semantics = [#tpu.dimension_semantics<parallel>, #tpu.dimension_semantics<parallel>], iteration_bounds = array<i64: 2, 1>, scalar_prefetch = 0 : i64, scratch_operands = 0 : i64, tpu.core_type = #tpu.core_type<tc>, window_params = [{transform_indices = @transform_0, window_bounds = array<i64: 1, 48, 16>}, {pipeline_mode = #tpu.pipeline_mode<synchronous>, transform_indices = @transform_1, window_bounds = array<i64: 96, 48>}, {pipeline_mode = #tpu.pipeline_mode<synchronous>, transform_indices = @transform_2, window_bounds = array<i64: 96, 3>}, {transform_indices = @transform_3, window_bounds = array<i64: 1, 96, 16>}]} {
    %c0 = arith.constant 0 : index
    %c0_0 = arith.constant 0 : index
    %c0_1 = arith.constant 0 : index
    %0 = vector.load %arg2[%c0, %c0_0, %c0_1] : memref<1x48x16xbf16, #tpu.memory_space<vmem>>, vector<1x48x16xbf16>
    %1 = vector.shape_cast %0 : vector<1x48x16xbf16> to vector<48x16xbf16>
    %c0_2 = arith.constant 0 : index
    %c0_3 = arith.constant 0 : index
    %2 = vector.load %arg3[%c0_2, %c0_3] : memref<96x48xbf16, #tpu.memory_space<vmem>>, vector<96x48xbf16>
    %cst = arith.constant dense<0.000000e+00> : vector<96x16xf32>
    %3 = tpu.matmul %2, %1, %cst {dimension_numbers = #tpu.dot_dimension_numbers<[1], [0], [0], [1], [0, 0, 1, 1], [], []>} : vector<96x48xbf16>, vector<48x16xbf16>, vector<96x16xf32> -> vector<96x16xf32>
    %c0_4 = arith.constant 0 : index
    %c0_5 = arith.constant 0 : index
    %4 = vector.load %arg4[%c0_4, %c0_5] : memref<96x3xf32, #tpu.memory_space<vmem>>, vector<96x1xf32>
    %c0_6 = arith.constant 0 : index
    %c1 = arith.constant 1 : index
    %5 = vector.load %arg4[%c0_6, %c1] : memref<96x3xf32, #tpu.memory_space<vmem>>, vector<96x1xf32>
    %c0_7 = arith.constant 0 : index
    %c2 = arith.constant 2 : index
    %6 = vector.load %arg4[%c0_7, %c2] : memref<96x3xf32, #tpu.memory_space<vmem>>, vector<96x1xf32>
    %7 = vector.broadcast %4 : vector<96x1xf32> to vector<96x16xf32>
    %8 = arith.addf %3, %7 : vector<96x16xf32>
    %cst_8 = arith.constant dense<0.000000e+00> : vector<16xf32>
    %9 = vector.multi_reduction <add>, %8, %cst_8 [0] : vector<96x16xf32> to vector<16xf32>
    %10 = vector.shape_cast %9 : vector<16xf32> to vector<1x16xf32>
    %cst_9 = arith.constant 0.010416667 : f32
    %11 = vector.broadcast %cst_9 : f32 to vector<1x16xf32>
    %12 = arith.mulf %10, %11 : vector<1x16xf32>
    %13 = vector.broadcast %12 : vector<1x16xf32> to vector<96x16xf32>
    %14 = arith.subf %8, %13 : vector<96x16xf32>
    %15 = arith.mulf %14, %14 : vector<96x16xf32>
    %cst_10 = arith.constant dense<0.000000e+00> : vector<16xf32>
    %16 = vector.multi_reduction <add>, %15, %cst_10 [0] : vector<96x16xf32> to vector<16xf32>
    %17 = vector.shape_cast %16 : vector<16xf32> to vector<1x16xf32>
    %cst_11 = arith.constant 0.010416667 : f32
    %18 = vector.broadcast %cst_11 : f32 to vector<1x16xf32>
    %19 = arith.mulf %17, %18 : vector<1x16xf32>
    %cst_12 = arith.constant 9.99999974E-6 : f32
    %20 = vector.broadcast %cst_12 : f32 to vector<1x16xf32>
    %21 = arith.addf %19, %20 : vector<1x16xf32>
    %22 = math.rsqrt %21 : vector<1x16xf32>
    %23 = vector.broadcast %22 : vector<1x16xf32> to vector<96x16xf32>
    %24 = arith.mulf %14, %23 : vector<96x16xf32>
    %25 = vector.broadcast %5 : vector<96x1xf32> to vector<96x16xf32>
    %26 = arith.mulf %24, %25 : vector<96x16xf32>
    %27 = vector.broadcast %6 : vector<96x1xf32> to vector<96x16xf32>
    %28 = arith.addf %26, %27 : vector<96x16xf32>
    %c0_13 = arith.constant 0 : index
    %c0_14 = arith.constant 0 : index
    %c0_15 = arith.constant 0 : index
    %29 = vector.load %arg5[%c0_13, %c0_14, %c0_15] : memref<1x96x16xf32, #tpu.memory_space<vmem>>, vector<1x96x16xf32>
    %30 = vector.shape_cast %29 : vector<1x96x16xf32> to vector<96x16xf32>
    %31 = vector.shape_cast %28 : vector<96x16xf32> to vector<1x96x16xf32>
    tpu.vector_store %arg5[%c0_13, %c0_14, %c0_15], %31 {strides = array<i32>} : memref<1x96x16xf32, #tpu.memory_space<vmem>>, vector<1x96x16xf32>,
    return
  }
  func.func @transform_0(%arg0: i32, %arg1: i32) -> (i32, i32, i32) {
    %c0_i32 = arith.constant 0 : i32
    %c0_i32_0 = arith.constant 0 : i32
    return %arg0, %c0_i32, %arg1 : i32, i32, i32
  }
  func.func @transform_1(%arg0: i32, %arg1: i32) -> (i32, i32) {
    %c0_i32 = arith.constant 0 : i32
    %c0_i32_0 = arith.constant 0 : i32
    %c0_i32_1 = arith.constant 0 : i32
    return %c0_i32, %c0_i32_0 : i32, i32
  }
  func.func @transform_2(%arg0: i32, %arg1: i32) -> (i32, i32) {
    %c0_i32 = arith.constant 0 : i32
    %c0_i32_0 = arith.constant 0 : i32
    %c0_i32_1 = arith.constant 0 : i32
    return %c0_i32, %c0_i32_0 : i32, i32
  }
  func.func @transform_3(%arg0: i32, %arg1: i32) -> (i32, i32, i32) {
    %c0_i32 = arith.constant 0 : i32
    %c0_i32_0 = arith.constant 0 : i32
    return %arg0, %c0_i32, %arg1 : i32, i32, i32
  }
}

</mosaic_0001>

<bundles_post_ra>
// kernel: tpu_custom_call.1
= control target key start
LH: loop header
LB: loop body
LE: loop exit
PB: predicated region body
PF: predicated region fallthrough
CT: control target
= control target key end

     0   :  { %s905_s12 = smov 0   ;;  %s907_s13 = smov 0   ;;  %s1144_s0 = inlined_call_operand.vmem [shape: bf16[2,48,16], index: 0, kind: input, shape index: {}]   ;;  %s1145_s1 = inlined_call_operand.vmem [shape: bf16[96,48], index: 1, kind: input, shape index: {}]   ;;  %s1146_s2 = inlined_call_operand.vmem [shape: f32[96,3], index: 2, kind: input, shape index: {}]   ;;  %s1147_s3 = inlined_call_operand.vmem [shape: f32[2,96,16], index: 3, kind: output, shape index: {}]  }
   0x1   :  { %s909_s14 = smov 0  }
   0x2 LB: > { %s25_s15 = sadd.s32 1, %s876_s13  ;;  %p759_p0 = scmp.ge.s32.totalorder %s880_s14, 1  ;;  %s880_s14 = sphi %s909_s14, %s13_s14   ;;  %s876_s13 = sphi %s907_s13, %s1149_s13   ;;  %s872_s12 = sphi %s905_s12, %s1148_s12  }
   0x3   : > { %p27_p1 = scmp.ge.s32.totalorder %s25_s15, 2  ;;  %p156_p2 = scmp.lt.s32.totalorder %s880_s14, 3 }
   0x5   : > { %s1151_s15 = smov (%p27_p1, %s25_s15), 0  ;;  %p157_p3 = pnand %p759_p0, %p156_p2 }
   0x6   : > { %p186_p4 = scmp.lt.s32.totalorder (!%p157_p3), %s872_s12, 1  ;;  %v850_v0 = vld [vmem:[%s1145_s1] sm:$0xff] (!%p157_p3)   ;;  %vm341_vm0 = vcmask (!%p157_p3), 392192   ;;  %v851_v1 = vld [vmem:[%s1145_s1 + $0x10] sm:$0xff] (!%p157_p3)   ;;  %v882_v2 = vmov (!%p157_p3), 0   ;;  %v222_v7 = vld [vmem:[%s1146_s2 + $0x8] sm:$0xff] (!%p157_p3) }
   0x7   : > { %160 = sbr.rel (%p157_p3) target bundleno = 354 (0x162), region = 32  ;;  %794 = vmatprep.mubr.msk.bf16.mxu0 (!%p157_p3), %vm341_vm0, %v850_v0  ;;  %798 = vmatprep.mubr.msk.bf16.mxu1 (!%p157_p3), %vm341_vm0, %v851_v1  ;;  %v940_v3 = vld [vmem:[%s1146_s2] sm:$0xff] (!%p157_p3)  ;;  %v945_v4 = vld [vmem:[%s1146_s2 + $0x10] sm:$0xff] (!%p157_p3)  ;;  %v224_v8 = vld [vmem:[%s1146_s2 + $0x18] sm:$0xff] (!%p157_p3)  ;;  %v883_v22 = vmov (!%p157_p3), 1   ;;  %v884_v23 = vmov (!%p157_p3), 2  }
   0x8   : > { %841 = vset.pattern.permute.xlu0 (!%p157_p3), %v882_v2  ;;  %842 = vset.pattern.permute.xlu1 (!%p157_p3), %v882_v2  ;;  %v225_v10 = vld [vmem:[%s1146_s2 + $0x20] sm:$0xff] (!%p157_p3)  ;;  %v226_v11 = vld [vmem:[%s1146_s2 + $0x28] sm:$0xff] (!%p157_p3)  ;;  %v853_v13 = vld [vmem:[%s1145_s1 + $0x18] sm:$0xff] (!%p157_p3)   ;;  %vm441_vm1 = vcmask (!%p157_p3), 130048  }
   0x9   : > { %235 = vperm.xlu0 (!%p157_p3), %841, %v940_v3   ;;  %245 = vperm.xlu1 (!%p157_p3), %842, %v945_v4   ;;  %v852_v12 = vld [vmem:[%s1145_s1 + $0x8] sm:$0xff] (!%p157_p3)   ;;  %v227_v14 = vld [vmem:[%s1146_s2 + $0x30] sm:$0xff] (!%p157_p3)  ;;  %v228_v15 = vld [vmem:[%s1146_s2 + $0x38] sm:$0xff] (!%p157_p3) }
   0xa   : > { %v854_v16 = vld [vmem:[%s1145_s1 + $0x20] sm:$0xff] (!%p157_p3)   ;;  %v230_v18 = vld [vmem:[%s1146_s2 + $0x48] sm:$0xff] (!%p157_p3)  ;;  %v231_v20 = vld [vmem:[%s1146_s2 + $0x50] sm:$0xff] (!%p157_p3) }
   0xb   : > { %v229_v17 = vld [vmem:[%s1146_s2 + $0x40] sm:$0xff] (!%p157_p3)  ;;  %v855_v19 = vld [vmem:[%s1145_s1 + $0x28] sm:$0xff] (!%p157_p3)   ;;  %v232_v21 = vld [vmem:[%s1146_s2 + $0x58] sm:$0xff] (!%p157_p3) }
   0xd   : > { %240 = vperm.xlu0 (!%p157_p3), %841, %v222_v7   ;;  %250 = vperm.xlu1 (!%p157_p3), %842, %v224_v8  }
   0xe   : > { %s1153_s12 = smov (!%p186_p4, %s872_s12), 1 }
   0xf   : > { %s812_s20 = smul.u32 24, %s1153_s12 }
  0x10   : > { %s813_s6 = smul.u32 96, %s1153_s12 }
  0x11   : > { %s193_s23 = scalar_lea.vmem %s1144_s0, %s812_s20  ;;  %255 = vperm.xlu0 %841, %v225_v10   ;;  %260 = vperm.xlu1 %842, %v226_v11  }
  0x12   : > { %v847_v5 = vld [vmem:[%s193_s23] sm:$0xff]   ;;  %v848_v6 = vld [vmem:[%s193_s23 + $0x8] sm:$0xff]   ;;  %v849_v9 = vld [vmem:[%s193_s23 + $0x10] sm:$0xff]   ;;  %s1103_s8 = scalar_lea.vmem %s1147_s3, %s813_s6 }
  0x13   : > { %788 = vmatprep.subr.bf16.mxu0 %v847_v5  ;;  %806 = vmatprep.subr.bf16.mxu1 %v847_v5 }
  0x14   : > { %789 = vmatpush3.bf16.msra.mxu0 %v847_v5  ;;  %809 = vmatpush3.bf16.msra.mxu1 %v847_v5 }
  0x15   : > { %790 = vmatprep.subr.bf16.mxu0 %v848_v6  ;;  %807 = vmatprep.subr.bf16.mxu1 %v848_v6 }
  0x16   : > { %265 = vperm.xlu0 %841, %v227_v14   ;;  %270 = vperm.xlu1 %842, %v228_v15  }
  0x18   : > { %791 = vmatpush3.bf16.msra.mxu0 %v848_v6  ;;  %810 = vmatpush3.bf16.msra.mxu1 %v848_v6 }
  0x19   : > { %792 = vmatprep.subr.bf16.mxu0 %v849_v9  ;;  %808 = vmatprep.subr.bf16.mxu1 %v849_v9 }
  0x1a   : > { %275 = vperm.xlu0 %841, %v229_v17   ;;  %280 = vperm.xlu1 %842, %v230_v18  }
  0x1c   : > { %793 = vmatpush3.bf16.msra.mxu0 %v849_v9  ;;  %811 = vmatpush3.bf16.msra.mxu1 %v849_v9 }
  0x1e   : > { %285 = vperm.xlu0 %841, %v231_v20   ;;  %290 = vperm.xlu1 %842, %v232_v21  }
  0x1f   : > { %795 = vmatmul.mubr.msk.bf16.vlgmr.msra.gmra.mrb[0].mxu0 %vm341_vm0, %v852_v12  ;;  %799 = vmatmul.mubr.msk.bf16.vlgmr.msra.gmra.mrb[0].mxu1 %vm341_vm0, %v853_v13 }
  0x20   : > { %802 = vmatprep.mubr.msk.bf16.mxu1 %vm341_vm0, %v854_v16 }
  0x22   : > { %844 = vset.pattern.permute.xlu1 %v883_v22  ;;  %843 = vset.pattern.permute.xlu0 %v883_v22 }
  0x23   : > { %545 = vperm.xlu1 %844, %v222_v7   ;;  %541 = vperm.xlu0 %843, %v940_v3  }
  0x27   : > { %803 = vmatmul.mubr.msk.bf16.gmra.mrb[4].mxu1 %vm341_vm0, %v855_v19  ;;  %549 = vperm.xlu1 %844, %v945_v4  }
  0x28   : > { %553 = vperm.xlu0 %843, %v224_v8  }
  0x2b   : > { %557 = vperm.xlu1 %844, %v225_v10  }
  0x2c   : > { %561 = vperm.xlu0 %843, %v226_v11  }
  0x2f   : > { %565 = vperm.xlu1 %844, %v227_v14  }
  0x30   : > { %569 = vperm.xlu0 %843, %v228_v15  }
  0x33   : > { %573 = vperm.xlu1 %844, %v229_v17  }
  0x34   : > { %577 = vperm.xlu0 %843, %v230_v18  }
  0x37   : > { %581 = vperm.xlu1 %844, %v231_v20  }
  0x38   : > { %585 = vperm.xlu0 %843, %v232_v21  }
  0x3b   : > { %845 = vset.pattern.permute.xlu1 %v884_v23 }
  0x3c   : > { %846 = vset.pattern.permute.xlu0 %v884_v23  ;;  %601 = vperm.xlu1 %845, %v940_v3  }
  0x3d   : > { %605 = vperm.xlu0 %846, %v222_v7  }
  0x40   : > { %609 = vperm.xlu1 %845, %v945_v4  }
  0x41   : > { %617 = vperm.xlu0 %846, %v225_v10  }
  0x44   : > { %613 = vperm.xlu1 %845, %v224_v8  }
  0x45   : > { %625 = vperm.xlu0 %846, %v227_v14  }
  0x48   : > { %621 = vperm.xlu1 %845, %v226_v11  }
  0x49   : > { %633 = vperm.xlu0 %846, %v229_v17  }
  0x4c   : > { %629 = vperm.xlu1 %845, %v228_v15  }
  0x4d   : > { %641 = vperm.xlu0 %846, %v231_v20  }
  0x50   : > { %637 = vperm.xlu1 %845, %v230_v18  }
  0x54   : > { %645 = vperm.xlu1 %845, %v232_v21  }
  0x88   : > { %v236_v24 = vpop.permute.xlu0 %235  ;;  %v246_v25 = vpop.permute.xlu1 %245 }
  0x8c   : > { %v241_v26 = vpop.permute.xlu0 %240  ;;  %v251_v27 = vpop.permute.xlu1 %250 }
  0x90   : > { %v256_v28 = vpop.permute.xlu0 %255  ;;  %v261_v29 = vpop.permute.xlu1 %260 }
  0x95   : > { %v266_v44 = vpop.permute.xlu0 %265  ;;  %v271_v49 = vpop.permute.xlu1 %270 }
  0x99   : > { %v276_v59 = vpop.permute.xlu0 %275  ;;  %v281_v63 = vpop.permute.xlu1 %280 }
  0x9d   : > { %v286_v6 = vpop.permute.xlu0 %285  ;;  %v291_v10 = vpop.permute.xlu1 %290 }
  0xa2   : > { %v1014_v23 = vpop.permute.xlu1 %545 }
  0xf2   : > { %v796_v30 = vpop.f32.mrb[0].mxu0  ;;  %v800_v31 = vpop.f32.mrb[0].mxu1 }
  0xf3   : > { %v394_v32 = vpop.f32.mrb[1].mxu0  ;;  %v410_v33 = vpop.f32.mrb[1].mxu1  ;;  %v403_v39 = vadd.f32 %v796_v30, %v246_v25  ;;  %v419_v57 = vadd.f32 %v800_v31, %v266_v44 }
  0xf4   : > { %v395_v34 = vadd.f32 %v394_v32, %v236_v24  ;;  %v797_v35 = vpop.f32.mrb[2].mxu0  ;;  %v801_v36 = vpop.f32.mrb[2].mxu1  ;;  %v411_v47 = vadd.f32 %v410_v33, %v256_v28 }
  0xf5   : > { %v397_v37 = vpop.f32.mrb[3].mxu0  ;;  %v413_v38 = vpop.f32.mrb[3].mxu1  ;;  %v406_v42 = vadd.f32 %v797_v35, %v251_v27  ;;  %v445_v46 = vsel %vm441_vm1, %v403_v39, 0.0  ;;  %v422_v61 = vadd.f32 %v801_v36, %v271_v49  ;;  %v453_v1 = vsel %vm441_vm1, %v419_v57, 0.0 }
  0xf6   : > { %v999_v40 = vadd.f32 %v397_v37, %v241_v26  ;;  %v442_v41 = vsel %vm441_vm1, %v395_v34, 0.0  ;;  %v414_v53 = vadd.f32 %v413_v38, %v261_v29  ;;  %v449_v58 = vsel %vm441_vm1, %v411_v47, 0.0  ;;  %v1016_v27 = vpop.permute.xlu1 %549 }
  0xf7   : > { %v447_v52 = vsel %vm441_vm1, %v406_v42, 0.0  ;;  %v455_v4 = vsel %vm441_vm1, %v422_v61, 0.0 }
  0xf8   : > { %v443_v43 = vsel %vm441_vm1, %v999_v40, 0.0  ;;  %v451_v62 = vsel %vm441_vm1, %v414_v53, 0.0 }
  0xf9   : > { %v444_v45 = vadd.f32 %v443_v43, %v442_v41 }
  0xfa   : > { %v804_v48 = vpop.f32.mrb[4].mxu1  ;;  %v1049_v44 = vpop.permute.xlu1 %557 }
  0xfb   : > { %v446_v50 = vadd.f32 %v445_v46, %v444_v45  ;;  %v426_v51 = vpop.f32.mrb[5].mxu1  ;;  %v435_v8 = vadd.f32 %v804_v48, %v286_v6  ;;  %v1051_v45 = vpop.permute.xlu0 %541 }
  0xfc   : > { %v805_v54 = vpop.f32.mrb[6].mxu1  ;;  %v427_v2 = vadd.f32 %v426_v51, %v276_v59 }
  0xfd   : > { %v448_v55 = vadd.f32 %v447_v52, %v446_v50  ;;  %v429_v56 = vpop.f32.mrb[7].mxu1  ;;  %v438_v12 = vadd.f32 %v805_v54, %v291_v10  ;;  %v461_v15 = vsel %vm441_vm1, %v435_v8, 0.0 }
  0xfe   : > { %v430_v5 = vadd.f32 %v429_v56, %v281_v63  ;;  %v457_v9 = vsel %vm441_vm1, %v427_v2, 0.0  ;;  %v1063_v54 = vpop.permute.xlu1 %565 }
  0xff   : > { %v450_v60 = vadd.f32 %v449_v58, %v448_v55  ;;  %v463_v17 = vsel %vm441_vm1, %v438_v12, 0.0  ;;  %v1065_v56 = vpop.permute.xlu0 %553 }
 0x100   : > { %v459_v13 = vsel %vm441_vm1, %v430_v5, 0.0 }
 0x101   : > { %v452_v0 = vadd.f32 %v451_v62, %v450_v60 }
 0x103   : > { %v454_v3 = vadd.f32 %v453_v1, %v452_v0  ;;  %v574_v1 = vpop.permute.xlu1 %573 }
 0x105   : > { %v456_v7 = vadd.f32 %v455_v4, %v454_v3  ;;  %v562_v3 = vpop.permute.xlu0 %561 }
 0x107   : > { %v458_v11 = vadd.f32 %v457_v9, %v456_v7 }
 0x109   : > { %v460_v14 = vadd.f32 %v459_v13, %v458_v11 }
 0x10b   : > { %v462_v16 = vadd.f32 %v461_v15, %v460_v14  ;;  %v570_v14 = vpop.permute.xlu0 %569 }
 0x10d   : > { %v464_v18 = vadd.f32 %v463_v17, %v462_v16 }
 0x10f   : > { %v465_v19 = vrot.slane %v464_v18, 4 }
 0x111   : > { %v466_v20 = vadd.f32 %v465_v19, %v464_v18 }
 0x113   : > { %v467_v21 = vrot.slane %v466_v20, 2 }
 0x115   : > { %v468_v22 = vadd.f32 %v467_v21, %v466_v20  ;;  %v578_v21 = vpop.permute.xlu0 %577 }
 0x117   : > { %v469_v24 = vrot.slane %v468_v22, 1 }
 0x119   : > { %v470_v25 = vadd.f32 %v469_v24, %v468_v22 }
 0x11b   : > { %v471_v26 = vmul.f32 0.010416667, %v470_v25 }
 0x11d   : > { %v1018_v28 = vsub.f32 %v395_v34, %v471_v26  ;;  %v1020_v29 = vsub.f32 %v403_v39, %v471_v26  ;;  %v1022_v30 = vsub.f32 %v406_v42, %v471_v26  ;;  %v1024_v31 = vsub.f32 %v411_v47, %v471_v26 }
 0x11e   : > { %v1026_v32 = vsub.f32 %v414_v53, %v471_v26  ;;  %v1028_v33 = vsub.f32 %v419_v57, %v471_v26  ;;  %v1030_v35 = vsub.f32 %v422_v61, %v471_v26  ;;  %v1032_v36 = vsub.f32 %v427_v2, %v471_v26 }
 0x11f   : > { %v1034_v37 = vsub.f32 %v430_v5, %v471_v26  ;;  %v1036_v38 = vsub.f32 %v435_v8, %v471_v26  ;;  %v1038_v34 = vsub.f32 %v438_v12, %v471_v26  ;;  %v1041_v39 = vsub.f32 %v999_v40, %v471_v26  ;;  %v582_v12 = vpop.permute.xlu1 %581 }
 0x120   : > { %v484_v41 = vmul.f32 %v1018_v28, %v1018_v28  ;;  %v486_v43 = vmul.f32 %v1020_v29, %v1020_v29  ;;  %v487_v46 = vmul.f32 %v1022_v30, %v1022_v30  ;;  %v488_v49 = vmul.f32 %v1024_v31, %v1024_v31 }
 0x121   : > { %v485_v42 = vmul.f32 %v1041_v39, %v1041_v39  ;;  %v489_v52 = vmul.f32 %v1026_v32, %v1026_v32  ;;  %v490_v57 = vmul.f32 %v1028_v33, %v1028_v33  ;;  %v491_v60 = vmul.f32 %v1030_v35, %v1030_v35 }
 0x122   : > { %v496_v47 = vsel %vm441_vm1, %v484_v41, 0.0  ;;  %v499_v50 = vsel %vm441_vm1, %v486_v43, 0.0  ;;  %v501_v53 = vsel %vm441_vm1, %v487_v46, 0.0  ;;  %v503_v58 = vsel %vm441_vm1, %v488_v49, 0.0  ;;  %v586_v41 = vpop.permute.xlu0 %585 }
 0x123   : > { %v497_v40 = vsel %vm441_vm1, %v485_v42, 0.0  ;;  %v505_v61 = vsel %vm441_vm1, %v489_v52, 0.0  ;;  %v492_v63 = vmul.f32 %v1032_v36, %v1032_v36  ;;  %v507_v0 = vsel %vm441_vm1, %v490_v57, 0.0  ;;  %v602_v19 = vpop.permute.xlu1 %601 }
 0x124   : > { %v498_v48 = vadd.f32 %v497_v40, %v496_v47  ;;  %v493_v4 = vmul.f32 %v1034_v37, %v1034_v37  ;;  %v509_v5 = vsel %vm441_vm1, %v491_v60, 0.0  ;;  %v494_v7 = vmul.f32 %v1036_v38, %v1036_v38 }
 0x125   : > { %v511_v8 = vsel %vm441_vm1, %v492_v63, 0.0  ;;  %v495_v11 = vmul.f32 %v1038_v34, %v1038_v34 }
 0x126   : > { %v500_v51 = vadd.f32 %v499_v50, %v498_v48  ;;  %v513_v10 = vsel %vm441_vm1, %v493_v4, 0.0  ;;  %v515_v15 = vsel %vm441_vm1, %v494_v7, 0.0  ;;  %v606_v46 = vpop.permute.xlu0 %605 }
 0x127   : > { %v517_v17 = vsel %vm441_vm1, %v495_v11, 0.0  ;;  %v610_v25 = vpop.permute.xlu1 %609 }
 0x128   : > { %v502_v55 = vadd.f32 %v501_v53, %v500_v51 }
 0x12a   : > { %v504_v59 = vadd.f32 %v503_v58, %v502_v55  ;;  %v618_v49 = vpop.permute.xlu0 %617 }
 0x12b   : > { %v614_v47 = vpop.permute.xlu1 %613 }
 0x12c   : > { %v506_v62 = vadd.f32 %v505_v61, %v504_v59 }
 0x12e   : > { %v508_v2 = vadd.f32 %v507_v0, %v506_v62  ;;  %v626_v51 = vpop.permute.xlu0 %625 }
 0x12f   : > { %v622_v50 = vpop.permute.xlu1 %621 }
 0x130   : > { %v510_v6 = vadd.f32 %v509_v5, %v508_v2 }
 0x132   : > { %v512_v9 = vadd.f32 %v511_v8, %v510_v6  ;;  %v634_v0 = vpop.permute.xlu0 %633 }
 0x133   : > { %v630_v52 = vpop.permute.xlu1 %629 }
 0x134   : > { %v514_v13 = vadd.f32 %v513_v10, %v512_v9 }
 0x136   : > { %v516_v16 = vadd.f32 %v515_v15, %v514_v13  ;;  %v642_v8 = vpop.permute.xlu0 %641 }
 0x138   : > { %v518_v18 = vadd.f32 %v517_v17, %v516_v16 }
 0x13a   : > { %v519_v20 = vrot.slane %v518_v18, 4 }
 0x13c   : > { %v520_v22 = vadd.f32 %v519_v20, %v518_v18 }
 0x13e   : > { %v521_v24 = vrot.slane %v520_v22, 2 }
 0x140   : > { %v522_v26 = vadd.f32 %v521_v24, %v520_v22 }
 0x142   : > { %v523_v42 = vrot.slane %v522_v26, 1 }
 0x144   : > { %v524_v43 = vadd.f32 %v523_v42, %v522_v26 }
 0x146   : > { %v525_v40 = vmul.f32 0.010416667, %v524_v43 }
 0x148   : > { %v526_v48 = vadd.f32 1e-05, %v525_v40 }
 0x14a   : > { %856 = vrsqrt.f32 %v526_v48 }
 0x154   : > { %v857_v53 = vpop.eup %856 }
 0x155   : > { %v529_v55 = vmul.f32 %v857_v53, %v1041_v39  ;;  %v530_v57 = vmul.f32 %v857_v53, %v1020_v29  ;;  %v532_v58 = vmul.f32 %v857_v53, %v1024_v31  ;;  %v528_v59 = vmul.f32 %v857_v53, %v1018_v28  ;;  %v638_v31 = vpop.permute.xlu1 %637 }
 0x156   : > { %v534_v60 = vmul.f32 %v857_v53, %v1028_v33  ;;  %v531_v61 = vmul.f32 %v857_v53, %v1022_v30  ;;  %v536_v62 = vmul.f32 %v857_v53, %v1032_v36  ;;  %v533_v63 = vmul.f32 %v857_v53, %v1026_v32 }
 0x157   : > { %v589_v2 = vmul.f32 %v1014_v23, %v529_v55  ;;  %v590_v4 = vmul.f32 %v1016_v27, %v530_v57  ;;  %v592_v39 = vmul.f32 %v1049_v44, %v532_v58  ;;  %v588_v29 = vmul.f32 %v1051_v45, %v528_v59 }
 0x158   : > { %v594_v28 = vmul.f32 %v1063_v54, %v534_v60  ;;  %v591_v30 = vmul.f32 %v1065_v56, %v531_v61  ;;  %v596_v32 = vmul.f32 %v574_v1, %v536_v62  ;;  %v593_v23 = vmul.f32 %v562_v3, %v533_v63 }
 0x159   : > { %v538_v27 = vmul.f32 %v857_v53, %v1036_v38  ;;  %v535_v33 = vmul.f32 %v857_v53, %v1030_v35  ;;  %v648_v36 = vadd.f32 %v602_v19, %v588_v29  ;;  %v537_v44 = vmul.f32 %v857_v53, %v1034_v37  ;;  %v646_v11 = vpop.permute.xlu1 %645 }
 0x15a   : > { %v650_v45 = vadd.f32 %v610_v25, %v590_v4  ;;  %v539_v5 = vmul.f32 %v857_v53, %v1038_v34  ;;  %v651_v6 = vadd.f32 %v614_v47, %v591_v30  ;;  %v653_v54 = vadd.f32 %v622_v50, %v593_v23 }
 0x15b   : > { %v598_v7 = vmul.f32 %v582_v12, %v538_v27  ;;  %v595_v56 = vmul.f32 %v570_v14, %v535_v33  ;;  %660 = vst.msk [vmem:[%s1103_s8] sm:$0xff] %vm441_vm1, %v648_v36  ;;  %v597_v1 = vmul.f32 %v578_v21, %v537_v44  ;;  %v649_v3 = vadd.f32 %v606_v46, %v589_v2 }
 0x15c   : > { %662 = vst.msk [vmem:[%s1103_s8 + $0x10] sm:$0xff] %vm441_vm1, %v650_v45  ;;  %v599_v35 = vmul.f32 %v586_v41, %v539_v5  ;;  %663 = vst.msk [vmem:[%s1103_s8 + $0x18] sm:$0xff] %vm441_vm1, %v651_v6  ;;  %v652_v37 = vadd.f32 %v618_v49, %v592_v39  ;;  %v654_v38 = vadd.f32 %v626_v51, %v594_v28 }
 0x15d   : > { %665 = vst.msk [vmem:[%s1103_s8 + $0x28] sm:$0xff] %vm441_vm1, %v653_v54  ;;  %v656_v34 = vadd.f32 %v634_v0, %v596_v32  ;;  %v655_v9 = vadd.f32 %v630_v52, %v595_v56  ;;  %661 = vst.msk [vmem:[%s1103_s8 + $0x8] sm:$0xff] %vm441_vm1, %v649_v3  ;;  %v657_v10 = vadd.f32 %v638_v31, %v597_v1 }
 0x15e   : > { %v658_v12 = vadd.f32 %v642_v8, %v598_v7  ;;  %664 = vst.msk [vmem:[%s1103_s8 + $0x20] sm:$0xff] %vm441_vm1, %v652_v37  ;;  %v659_v13 = vadd.f32 %v646_v11, %v599_v35  ;;  %666 = vst.msk [vmem:[%s1103_s8 + $0x30] sm:$0xff] %vm441_vm1, %v654_v38 }
 0x15f   : > { %668 = vst.msk [vmem:[%s1103_s8 + $0x40] sm:$0xff] %vm441_vm1, %v656_v34  ;;  %667 = vst.msk [vmem:[%s1103_s8 + $0x38] sm:$0xff] %vm441_vm1, %v655_v9 }
 0x160   : > { %669 = vst.msk [vmem:[%s1103_s8 + $0x48] sm:$0xff] %vm441_vm1, %v657_v10  ;;  %670 = vst.msk [vmem:[%s1103_s8 + $0x50] sm:$0xff] %vm441_vm1, %v658_v12 }
 0x161   : > { %671 = vst.msk [vmem:[%s1103_s8 + $0x58] sm:$0xff] %vm441_vm1, %v659_v13 }
 0x162 PF: > { %s13_s14 = sadd.s32 1, %s880_s14   ;;  %s1148_s12 = smov %s876_s13 }
 0x163   : > { %p10_p5 = scmp.ge.s32.totalorder %s13_s14, 4   ;;  %s1149_s13 = smov %s1151_s15 }
 0x165   :  { %12 = sbr.rel (!%p10_p5) target bundleno = 2 (0x2), region = 62 }

</bundles_post_ra>
